<compile_context>
chip_gen: v7x
topology: tpu7x:2x2x1
jax: 0.10.0
libtpu: 0.0.40
codegen_flags: <defaults>
</compile_context>

<pallas_src>
import math
import functools

import jax
import jax.numpy as jnp
from jax.experimental import pallas as pl
from jax.experimental.pallas import tpu as pltpu


_NEG_INF = -1e30                 # finite mask value (avoids NaN in online softmax)


def _vmem_capacity_bytes():
    try:
        return int(pltpu.get_tpu_info().vmem_capacity_bytes)
    except Exception:
        return 64 * 1024 * 1024  # conservative default (v7x per-TC VMEM)


_VMEM_CAP = _vmem_capacity_bytes()
# ~96 MiB on 128-MiB parts (v5e/v6e), ~48 MiB on 64-MiB parts (v7x).
_VMEM_LIMIT = int(min(100 * 1024 * 1024, 0.75 * _VMEM_CAP))
_BM_MAX = 1024 if _VMEM_CAP >= 100 * 1024 * 1024 else 512


def _round_up(x, m):
    return ((x + m - 1) // m) * m


def _pick_tile(dim, candidates):
    for c in candidates:
        if dim >= c and dim % c == 0:
            return c
    return dim  # fall back to full extent (allowed by the (8,128) rule)


def _pick_bm(m):
    if m >= _BM_MAX:
        return _BM_MAX
    return _round_up(m, 16)      # bf16 min sublane tile is (16,128)


def _pad_rows(x, m_pad):
    m = x.shape[0]
    if m == m_pad:
        return x
    return jnp.pad(x, ((0, m_pad - m), (0, 0)))


# ----------------------------------------------------------------------------
# Kernel 1: tiled matmul + bias (+ optional ReLU), f32 accumulator
# ----------------------------------------------------------------------------
def _linear_kernel(x_ref, w_ref, b_ref, o_ref, acc_ref, *, activation, nk):
    k = pl.program_id(2)

    @pl.when(k == 0)
    def _init():
        acc_ref[...] = jnp.zeros_like(acc_ref)

    acc_ref[...] += jnp.dot(x_ref[...], w_ref[...],
                            preferred_element_type=jnp.float32)

    @pl.when(k == nk - 1)
    def _epilogue():
        y = acc_ref[...] + b_ref[...].astype(jnp.float32)
        if activation == "relu":
            y = jnp.maximum(y, 0.0)
        o_ref[...] = y.astype(o_ref.dtype)


def linear(x, w, b, activation=None, out_dtype=None):
    """(M, K) @ (K, N) + b -> (M, N); grid (M/bm, N/bn, K/bk), weights streamed."""
    M, K = x.shape
    N = w.shape[1]
    out_dtype = out_dtype or x.dtype

    bm = _pick_bm(M)
    m_pad = _round_up(M, bm)
    bk = _pick_tile(K, (512, 256, 128))
    bn = _pick_tile(N, (1024, 512, 256, 128))
    nk = K // bk
    grid = (m_pad // bm, N // bn, nk)

    xp = _pad_rows(x, m_pad)
    cost = pl.CostEstimate(
        flops=2 * m_pad * N * K,
        transcendentals=0,
        bytes_accessed=int(xp.size * xp.dtype.itemsize
                           + w.size * w.dtype.itemsize + b.size * 4
                           + m_pad * N * jnp.dtype(out_dtype).itemsize))

    out = pl.pallas_call(
        functools.partial(_linear_kernel, activation=activation, nk=nk),
        out_shape=jax.ShapeDtypeStruct((m_pad, N), out_dtype),
        grid=grid,
        in_specs=[
            pl.BlockSpec((bm, bk), lambda i, j, k: (i, k)),
            pl.BlockSpec((bk, bn), lambda i, j, k: (k, j)),
            pl.BlockSpec((1, bn), lambda i, j, k: (0, j)),
        ],
        out_specs=pl.BlockSpec((bm, bn), lambda i, j, k: (i, j)),
        scratch_shapes=[pltpu.VMEM((bm, bn), jnp.float32)],
        compiler_params=pltpu.CompilerParams(
            dimension_semantics=("parallel", "parallel", "arbitrary"),
            vmem_limit_bytes=_VMEM_LIMIT),
        cost_estimate=cost,
    )(xp, w, b.reshape(1, N).astype(jnp.float32))
    return out[:M]


# ----------------------------------------------------------------------------
# Kernel 2: tiled matmul + bias + residual add + LayerNorm fused epilogue
# (output dim kept full-width so the LN reduction is local to the epilogue)
# ----------------------------------------------------------------------------
def _linear_res_ln_kernel(x_ref, w_ref, b_ref, r_ref, g_ref, bt_ref, o_ref,
                          acc_ref, *, eps, nk):
    k = pl.program_id(1)

    @pl.when(k == 0)
    def _init():
        acc_ref[...] = jnp.zeros_like(acc_ref)

    acc_ref[...] += jnp.dot(x_ref[...], w_ref[...],
                            preferred_element_type=jnp.float32)

    @pl.when(k == nk - 1)
    def _epilogue():
        y = (acc_ref[...] + b_ref[...].astype(jnp.float32)
             + r_ref[...].astype(jnp.float32))
        mu = jnp.mean(y, axis=-1, keepdims=True)
        yc = y - mu
        var = jnp.mean(yc * yc, axis=-1, keepdims=True)
        inv = jax.lax.rsqrt(var + eps)
        o = (yc * inv * g_ref[...].astype(jnp.float32)
             + bt_ref[...].astype(jnp.float32))
        o_ref[...] = o.astype(o_ref.dtype)


def linear_residual_layernorm(x, w, b, residual, gamma, beta, eps=1e-5,
                              out_dtype=None):
    M, K = x.shape
    N = w.shape[1]
    out_dtype = out_dtype or residual.dtype
    out_bytes = jnp.dtype(out_dtype).itemsize

    bm = _pick_bm(M)
    bk = _pick_tile(K, (512, 256, 128))

    def vmem_est(bm_, bk_):
        return (bm_ * N * 4                              # f32 accumulator
                + 2 * bm_ * bk_ * x.dtype.itemsize       # x blocks (double buf)
                + 2 * bk_ * N * w.dtype.itemsize         # weight blocks
                + 2 * bm_ * N * residual.dtype.itemsize  # residual blocks
                + 2 * bm_ * N * out_bytes                # output blocks
                + 6 * N * 4)                             # bias / gamma / beta

    # v7x / large-d_model guard: shrink bm (then bk) until the fused
    # full-width-N kernel fits comfortably inside the VMEM budget.
    budget = int(0.7 * _VMEM_LIMIT)
    while vmem_est(bm, bk) > budget and bm > 64:
        bm = max(64, _round_up(bm // 2, 16))
    while vmem_est(bm, bk) > budget and bk > 128 and K % (bk // 2) == 0:
        bk //= 2

    m_pad = _round_up(M, bm)
    nk = K // bk
    grid = (m_pad // bm, nk)

    xp = _pad_rows(x, m_pad)
    rp = _pad_rows(residual, m_pad)

    cost = pl.CostEstimate(
        flops=2 * m_pad * N * K + 8 * m_pad * N,
        transcendentals=m_pad,
        bytes_accessed=int(xp.size * xp.dtype.itemsize
                           + w.size * w.dtype.itemsize
                           + rp.size * rp.dtype.itemsize
                           + m_pad * N * out_bytes))

    out = pl.pallas_call(
        functools.partial(_linear_res_ln_kernel, eps=eps, nk=nk),
        out_shape=jax.ShapeDtypeStruct((m_pad, N), out_dtype),
        grid=grid,
        in_specs=[
            pl.BlockSpec((bm, bk), lambda i, k: (i, k)),
            pl.BlockSpec((bk, N), lambda i, k: (k, 0)),
            pl.BlockSpec((1, N), lambda i, k: (0, 0)),
            pl.BlockSpec((bm, N), lambda i, k: (i, 0)),
            pl.BlockSpec((1, N), lambda i, k: (0, 0)),
            pl.BlockSpec((1, N), lambda i, k: (0, 0)),
        ],
        out_specs=pl.BlockSpec((bm, N), lambda i, k: (i, 0)),
        scratch_shapes=[pltpu.VMEM((bm, N), jnp.float32)],
        compiler_params=pltpu.CompilerParams(
            dimension_semantics=("parallel", "arbitrary"),
            vmem_limit_bytes=_VMEM_LIMIT),
        cost_estimate=cost,
    )(xp, w, b.reshape(1, N).astype(jnp.float32), rp,
      gamma.reshape(1, N).astype(jnp.float32),
      beta.reshape(1, N).astype(jnp.float32))
    return out[:M]


# ----------------------------------------------------------------------------
# Kernel 3: flash-style causal attention (online softmax, head-packed blocks,
# bf16 MXU inputs, diagonal-only masking, causal K/V-DMA skip)
# ----------------------------------------------------------------------------
def _flash_attn_kernel(q_ref, k_ref, v_ref, o_ref, m_ref, l_ref, acc_ref, *,
                       tq, tk, nkv):
    qi = pl.program_id(2)
    kv = pl.program_id(3)

    @pl.when(kv == 0)
    def _init():
        m_ref[...] = jnp.full_like(m_ref, _NEG_INF)
        l_ref[...] = jnp.zeros_like(l_ref)
        acc_ref[...] = jnp.zeros_like(acc_ref)

    q_start = qi * tq
    k_start = kv * tk
    has_work = k_start < q_start + tq              # tile has unmasked entries
    on_diagonal = (k_start + tk - 1) > q_start     # tile crosses the diagonal

    def step(masked):
        # bf16 MXU inputs, f32 accumulation; 1/sqrt(Dh) pre-folded into W_q.
        s = jnp.einsum("hqd,hkd->hqk", q_ref[0], k_ref[0],
                       preferred_element_type=jnp.float32)
        if masked:
            row = jax.lax.broadcasted_iota(jnp.int32, (tq, tk), 0) + q_start
            col = jax.lax.broadcasted_iota(jnp.int32, (tq, tk), 1) + k_start
            s = jnp.where((row >= col)[None, :, :], s, _NEG_INF)
        m_prev = m_ref[...]
        m_new = jnp.maximum(m_prev, jnp.max(s, axis=-1, keepdims=True))
        alpha = jnp.exp(m_prev - m_new)
        p = jnp.exp(s - m_new)
        l_ref[...] = alpha * l_ref[...] + jnp.sum(p, axis=-1, keepdims=True)
        acc_ref[...] = alpha * acc_ref[...] + jnp.einsum(
            "hqk,hkd->hqd", p.astype(v_ref.dtype), v_ref[0],
            preferred_element_type=jnp.float32)
        m_ref[...] = m_new

    @pl.when(jnp.logical_and(has_work, on_diagonal))
    def _diag_tile():           # only the diagonal tile pays for the mask
        step(masked=True)

    @pl.when(jnp.logical_and(has_work, jnp.logical_not(on_diagonal)))
    def _interior_tile():       # unmasked fast path
        step(masked=False)

    @pl.when(kv == nkv - 1)
    def _finalize():
        inv = pl.reciprocal(l_ref[...], approx=True)
        o_ref[0] = (acc_ref[...] * inv).astype(o_ref.dtype)


def flash_causal_attention(qkv, B, S, H, Dh):
    """qkv: (B*S, 3*H*Dh) packed [Q|K|V] -> (B*S, H*Dh) causal MHA output."""
    D = H * Dh

    # Single fused reshape+transpose: (B*S, 3D) -> (3, B, H, S, Dh).
    qkv5 = qkv.reshape(B, S, 3, H, Dh).transpose(2, 0, 3, 1, 4)

    if S >= 256:
        t = 256
    elif S >= 128:
        t = 128
    else:
        t = _round_up(S, 8)
    tq = tk = t
    s_pad = _round_up(S, t)
    if s_pad != S:
        qkv5 = jnp.pad(qkv5, ((0, 0), (0, 0), (0, 0), (0, s_pad - S), (0, 0)))
    # Merge the q/k/v selector into the batch axis -> 4-D array (3B, H, S, Dh).
    qkv4 = qkv5.reshape(3 * B, H, s_pad, Dh)

    # Pack several heads per block when Dh < 128 to keep lanes busier.
    hb = min(H, max(1, 128 // max(Dh, 1)))
    while H % hb:
        hb -= 1

    nq = s_pad // tq
    nkv = s_pad // tk
    grid = (B, H // hb, nq, nkv)

    def kv_block(qi, kv):
        # Clamp fully-masked kv tiles onto the last needed block so the
        # repeated block index suppresses the K/V DMA for the causal upper
        # triangle (pl.when alone only skips the compute).
        return jnp.minimum(kv, (qi * tq + tq - 1) // tk)

    q_map = lambda b, g, qi, kv: (b, g, qi, 0)
    k_map = lambda b, g, qi, kv: (B + b, g, kv_block(qi, kv), 0)
    v_map = lambda b, g, qi, kv: (2 * B + b, g, kv_block(qi, kv), 0)

    cost = pl.CostEstimate(
        flops=2 * B * H * s_pad * s_pad * Dh,          # ~causal half of 4*S^2*Dh
        transcendentals=B * H * s_pad * s_pad // 2,
        bytes_accessed=int(4 * B * H * s_pad * Dh * qkv.dtype.itemsize))

    out = pl.pallas_call(
        functools.partial(_flash_attn_kernel, tq=tq, tk=tk, nkv=nkv),
        out_shape=jax.ShapeDtypeStruct((B, H, s_pad, Dh), qkv.dtype),
        grid=grid,
        in_specs=[
            pl.BlockSpec((1, hb, tq, Dh), q_map),
            pl.BlockSpec((1, hb, tk, Dh), k_map),
            pl.BlockSpec((1, hb, tk, Dh), v_map),
        ],
        out_specs=pl.BlockSpec((1, hb, tq, Dh),
                               lambda b, g, qi, kv: (b, g, qi, 0)),
        scratch_shapes=[
            pltpu.VMEM((hb, tq, 1), jnp.float32),   # running max
            pltpu.VMEM((hb, tq, 1), jnp.float32),   # running sum
            pltpu.VMEM((hb, tq, Dh), jnp.float32),  # output accumulator
        ],
        compiler_params=pltpu.CompilerParams(
            dimension_semantics=("parallel", "parallel", "parallel",
                                 "arbitrary"),
            vmem_limit_bytes=_VMEM_LIMIT),
        cost_estimate=cost,
    )(qkv4, qkv4, qkv4)

    out = out[:, :, :S, :]
    # TODO(synk): a lane-dense (hb*Dh)-packed output layout with in-kernel
    # per-head lane slicing would remove this final transpose as well.
    return out.transpose(0, 2, 1, 3).reshape(B * S, D)


# ----------------------------------------------------------------------------
# Parameter construction (deterministic, synthetic)
# ----------------------------------------------------------------------------
def sinusoidal_pe(max_len, d_model):
    pos = jnp.arange(max_len, dtype=jnp.float32)[:, None]
    div = jnp.exp(jnp.arange(0, d_model, 2, dtype=jnp.float32)
                  * (-math.log(10000.0) / d_model))
    pe = jnp.zeros((max_len, d_model), jnp.float32)
    pe = pe.at[:, 0::2].set(jnp.sin(pos * div))
    pe = pe.at[:, 1::2].set(jnp.cos(pos * div))
    return pe


def init_params(key, vocab_size, d_model, nhead, num_layers, dim_feedforward,
                max_len):
    dh = d_model // nhead
    q_scale = 1.0 / math.sqrt(dh)

    def normal(k, shape, scale=0.02):
        return scale * jax.random.normal(k, shape, dtype=jnp.float32)

    keys = jax.random.split(key, 2 + num_layers)
    params = {
        "d_model": d_model,
        "nhead": nhead,
        "emb": normal(keys[0], (vocab_size, d_model)).astype(jnp.bfloat16),
        "pe": sinusoidal_pe(max_len, d_model),
        "w_out": normal(keys[1], (d_model, vocab_size)).astype(jnp.bfloat16),
        "b_out": jnp.zeros((vocab_size,), jnp.float32),
        "layers": [],
    }
    for li in range(num_layers):
        lk = jax.random.split(keys[2 + li], 4)
        w_qkv = normal(lk[0], (d_model, 3 * d_model))
        b_qkv = jnp.zeros((3 * d_model,), jnp.float32)
        # Fold the 1/sqrt(Dh) attention scale into the Q projection so the
        # attention kernel never multiplies by it (free at param-prep time).
        w_qkv = w_qkv.at[:, :d_model].multiply(q_scale)
        b_qkv = b_qkv.at[:d_model].multiply(q_scale)
        params["layers"].append({
            "w_qkv": w_qkv.astype(jnp.bfloat16),
            "b_qkv": b_qkv,
            "w_o":   normal(lk[1], (d_model, d_model)).astype(jnp.bfloat16),
            "b_o":   jnp.zeros((d_model,), jnp.float32),
            "ln1_g": jnp.ones((d_model,), jnp.float32),
            "ln1_b": jnp.zeros((d_model,), jnp.float32),
            "w_ff1": normal(lk[2], (d_model, dim_feedforward)).astype(jnp.bfloat16),
            "b_ff1": jnp.zeros((dim_feedforward,), jnp.float32),
            "w_ff2": normal(lk[3], (dim_feedforward, d_model)).astype(jnp.bfloat16),
            "b_ff2": jnp.zeros((d_model,), jnp.float32),
            "ln2_g": jnp.ones((d_model,), jnp.float32),
            "ln2_b": jnp.zeros((d_model,), jnp.float32),
        })
    return params


# ----------------------------------------------------------------------------
# Forward pass
# ----------------------------------------------------------------------------
def gpt_forward(params, ids):
    B, S = ids.shape
    D = params["d_model"]
    H = params["nhead"]
    Dh = D // H
    vocab = params["w_out"].shape[1]

    # Embedding gather in bf16, cast the gathered slice only; faithful
    # sqrt(seq_len) scale (see module-level note) + sinusoidal PE.
    x = jnp.take(params["emb"], ids, axis=0).astype(jnp.float32)   # (B, S, D)
    x = x * (float(S) ** 0.5)
    x = x + params["pe"][:S][None, :, :]
    x = x.astype(jnp.bfloat16).reshape(B * S, D)

    for lp in params["layers"]:
        # ---- causal multi-head self-attention ----
        qkv = linear(x, lp["w_qkv"], lp["b_qkv"])                  # (BS, 3D)
        attn = flash_causal_attention(qkv, B, S, H, Dh)            # (BS, D)
        # output projection + residual add + LayerNorm (post-norm), fused
        x = linear_residual_layernorm(attn, lp["w_o"], lp["b_o"], x,
                                      lp["ln1_g"], lp["ln1_b"])

        # ---- feed-forward: FF1 (+ReLU); FF2 + residual + LayerNorm fused ----
        h = linear(x, lp["w_ff1"], lp["b_ff1"], activation="relu")
        x = linear_residual_layernorm(h, lp["w_ff2"], lp["b_ff2"], x,
                                      lp["ln2_g"], lp["ln2_b"])

    logits = linear(x, params["w_out"], params["b_out"],
                    out_dtype=jnp.float32)                          # (BS, vocab)
    return logits.reshape(B, S, vocab)


# ----------------------------------------------------------------------------
if __name__ == "__main__":
    vocab_size = 128
    d_model = 32
    nhead = 4
    num_layers = 2
    dim_feedforward = 64
    max_len = 64
    batch, seq = 2, 8

    key = jax.random.PRNGKey(0)
    pkey, dkey = jax.random.split(key)
    params = init_params(pkey, vocab_size, d_model, nhead, num_layers,
                         dim_feedforward, max_len)
    ids = jax.random.randint(dkey, (batch, seq), 0, vocab_size, dtype=jnp.int32)

    logits = gpt_forward(params, ids)
    logits = jax.block_until_ready(logits)
    assert logits.shape == (batch, seq, vocab_size)
    assert jnp.isfinite(logits).all()
    print("KERNEL_OK")
</pallas_src>

<mosaic_0001>
module attributes {stable_mosaic.version = 11 : i64} {
  func.func @_linear_kernel(%arg0: i32, %arg1: i32, %arg2: i32, %arg3: memref<16x32xbf16, #tpu.memory_space<vmem>>, %arg4: memref<32x96xbf16, #tpu.memory_space<vmem>>, %arg5: memref<1x96xf32, #tpu.memory_space<vmem>>, %arg6: memref<16x96xbf16, #tpu.memory_space<vmem>>, %arg7: memref<16x96xf32, #tpu.memory_space<vmem>>) attributes {dimension_semantics = [#tpu.dimension_semantics<parallel>, #tpu.dimension_semantics<parallel>, #tpu.dimension_semantics<arbitrary>], iteration_bounds = array<i64: 1, 1, 1>, scalar_prefetch = 0 : i64, scratch_operands = 1 : i64, tpu.core_type = #tpu.core_type<tc>, window_params = [{transform_indices = @transform_0, window_bounds = array<i64: 16, 32>}, {transform_indices = @transform_1, window_bounds = array<i64: 32, 96>}, {transform_indices = @transform_2, window_bounds = array<i64: 1, 96>}, {transform_indices = @transform_3, window_bounds = array<i64: 16, 96>}]} {
    %c0_i32 = arith.constant 0 : i32
    %0 = arith.cmpi eq, %arg2, %c0_i32 : i32
    %1 = arith.extui %0 : i1 to i32
    %c0_i32_0 = arith.constant 0 : i32
    %2 = arith.cmpi ne, %1, %c0_i32_0 : i32
    scf.if %2 {
      %cst_10 = arith.constant 0.000000e+00 : f32
      %12 = vector.broadcast %cst_10 : f32 to vector<16x96xf32>
      %c0_11 = arith.constant 0 : index
      %c0_12 = arith.constant 0 : index
      %13 = vector.load %arg7[%c0_11, %c0_12] : memref<16x96xf32, #tpu.memory_space<vmem>>, vector<16x96xf32>
      tpu.vector_store %arg7[%c0_11, %c0_12], %12 {strides = array<i32>} : memref<16x96xf32, #tpu.memory_space<vmem>>, vector<16x96xf32>,
    } else {
    }
    %c0 = arith.constant 0 : index
    %c0_1 = arith.constant 0 : index
    %3 = vector.load %arg7[%c0, %c0_1] : memref<16x96xf32, #tpu.memory_space<vmem>>, vector<16x96xf32>
    %c0_2 = arith.constant 0 : index
    %c0_3 = arith.constant 0 : index
    %4 = vector.load %arg3[%c0_2, %c0_3] : memref<16x32xbf16, #tpu.memory_space<vmem>>, vector<16x32xbf16>
    %c0_4 = arith.constant 0 : index
    %c0_5 = arith.constant 0 : index
    %5 = vector.load %arg4[%c0_4, %c0_5] : memref<32x96xbf16, #tpu.memory_space<vmem>>, vector<32x96xbf16>
    %cst = arith.constant dense<0.000000e+00> : vector<16x96xf32>
    %6 = tpu.matmul %4, %5, %cst {dimension_numbers = #tpu.dot_dimension_numbers<[1], [0], [0], [1], [0, 0, 1, 1], [], []>} : vector<16x32xbf16>, vector<32x96xbf16>, vector<16x96xf32> -> vector<16x96xf32>
    %7 = arith.addf %3, %6 : vector<16x96xf32>
    %c0_6 = arith.constant 0 : index
    %c0_7 = arith.constant 0 : index
    %8 = vector.load %arg7[%c0_6, %c0_7] : memref<16x96xf32, #tpu.memory_space<vmem>>, vector<16x96xf32>
    tpu.vector_store %arg7[%c0_6, %c0_7], %7 {strides = array<i32>} : memref<16x96xf32, #tpu.memory_space<vmem>>, vector<16x96xf32>,
    %c0_i32_8 = arith.constant 0 : i32
    %9 = arith.cmpi eq, %arg2, %c0_i32_8 : i32
    %10 = arith.extui %9 : i1 to i32
    %c0_i32_9 = arith.constant 0 : i32
    %11 = arith.cmpi ne, %10, %c0_i32_9 : i32
    scf.if %11 {
      %c0_10 = arith.constant 0 : index
      %c0_11 = arith.constant 0 : index
      %12 = vector.load %arg7[%c0_10, %c0_11] : memref<16x96xf32, #tpu.memory_space<vmem>>, vector<16x96xf32>
      %c0_12 = arith.constant 0 : index
      %c0_13 = arith.constant 0 : index
      %13 = vector.load %arg5[%c0_12, %c0_13] : memref<1x96xf32, #tpu.memory_space<vmem>>, vector<1x96xf32>
      %14 = vector.broadcast %13 : vector<1x96xf32> to vector<16x96xf32>
      %15 = arith.addf %12, %14 : vector<16x96xf32>
      %16 = arith.truncf %15 : vector<16x96xf32> to vector<16x96xbf16>
      %c0_14 = arith.constant 0 : index
      %c0_15 = arith.constant 0 : index
      %17 = vector.load %arg6[%c0_14, %c0_15] : memref<16x96xbf16, #tpu.memory_space<vmem>>, vector<16x96xbf16>
      tpu.vector_store %arg6[%c0_14, %c0_15], %16 {strides = array<i32>} : memref<16x96xbf16, #tpu.memory_space<vmem>>, vector<16x96xbf16>,
    } else {
    }
    return
  }
  func.func @transform_0(%arg0: i32, %arg1: i32, %arg2: i32) -> (i32, i32) {
    %c0_i32 = arith.constant 0 : i32
    return %arg0, %arg2 : i32, i32
  }
  func.func @transform_1(%arg0: i32, %arg1: i32, %arg2: i32) -> (i32, i32) {
    %c0_i32 = arith.constant 0 : i32
    return %arg2, %arg1 : i32, i32
  }
  func.func @transform_2(%arg0: i32, %arg1: i32, %arg2: i32) -> (i32, i32) {
    %c0_i32 = arith.constant 0 : i32
    %c0_i32_0 = arith.constant 0 : i32
    return %c0_i32, %arg1 : i32, i32
  }
  func.func @transform_3(%arg0: i32, %arg1: i32, %arg2: i32) -> (i32, i32) {
    %c0_i32 = arith.constant 0 : i32
    return %arg0, %arg1 : i32, i32
  }
}

</mosaic_0001>

<bundles_post_ra>
// kernel: tpu_custom_call.1
= control target key start
LH: loop header
LB: loop body
LE: loop exit
PB: predicated region body
PF: predicated region fallthrough
CT: control target
= control target key end

     0   :  { %8 = vsyncpa [#allocation4], 0  ;;  %s350_s0 = inlined_call_operand.hbm [shape: bf16[16,32], index: 0, kind: input, shape index: {}]   ;;  %s351_s1 = inlined_call_operand.hbm [shape: bf16[32,96], index: 1, kind: input, shape index: {}]   ;;  %s352_s2 = inlined_call_operand.vmem [shape: f32[1,96], index: 2, kind: input, shape index: {}]   ;;  %s353_s3 = inlined_call_operand.hbm [shape: bf16[16,96], index: 3, kind: output, shape index: {}]  }
   0x1   :  { %9 = vsyncpa [#allocation7], 0 }
   0x2   :  { %10 = vsyncpa [#allocation5], 0  ;;  %s271_s12 = smov [#allocation3]   ;;  %s199_s16 = scalar_lea.hbm %s350_s0, 128 }
   0x3   :  { %s16_s13 = sshll.u32 %s271_s12, 4  ;;  %p200_p0 = scmp.ne.s32.totalorder %s350_s0, %s199_s16  ;;  %s17_s13 = int_to_ptr.vmem [resolvable:$true] %s16_s13 }
   0x4   :  { %p203_p1 = scmp.lt.u32.totalorder %s199_s16, %s350_s0 }
   0x6   :  { %p205_p2 = pnand %p203_p1, %p200_p0 }
   0x8   :  { %208 = shalt.err (!%p205_p2)
}
   0x9   :  { %s209_s21 = scalar_lea.vmem %s17_s13, 128  ;;  %p214_p4 = scmp.lt.s32.totalorder %s17_s13, %s17_s13 }
   0xa   :  { %p210_p3 = scmp.ne.s32.totalorder %s17_s13, %s209_s21  ;;  %p215_p5 = scmp.lt.s32.totalorder %s209_s21, %s209_s21 }
   0xc   :  { %p216_p6 = por %p215_p5, %p214_p4 }
   0xe   :  { %p217_p7 = pnand %p216_p6, %p210_p3 }
  0x10   :  { %220 = shalt.err (!%p217_p7)
}
  0x11   :  { %s272_s22 = smov 64   ;;  %s273_s23 = smov 4  }
  0x12   :  { %22 = dma.hbm_to_vmem [thread:$0]  %s350_s0, 128, %s17_s13, [#allocation4], %s272_s22, %s272_s22, %s273_s23  }
  0x13   :  { %s274_s26 = smov [#allocation6]   ;;  %s221_s30 = scalar_lea.hbm %s351_s1, 256 }
  0x14   :  { %s28_s27 = sshll.u32 %s274_s26, 4  ;;  %p222_p8 = scmp.ne.s32.totalorder %s351_s1, %s221_s30  ;;  %s29_s27 = int_to_ptr.vmem [resolvable:$true] %s28_s27 }
  0x15   :  { %p225_p9 = scmp.lt.u32.totalorder %s221_s30, %s351_s1 }
  0x17   :  { %p227_p10 = pnand %p225_p9, %p222_p8 }
  0x19   :  { %230 = shalt.err (!%p227_p10)
}
  0x1a   :  { %s231_s8 = scalar_lea.vmem %s29_s27, 256  ;;  %p236_p12 = scmp.lt.s32.totalorder %s29_s27, %s29_s27 }
  0x1b   :  { %p232_p11 = scmp.ne.s32.totalorder %s29_s27, %s231_s8  ;;  %p237_p13 = scmp.lt.s32.totalorder %s231_s8, %s231_s8 }
  0x1d   :  { %p238_p0 = por %p237_p13, %p236_p12 }
  0x1f   :  { %p239_p1 = pnand %p238_p0, %p232_p11 }
  0x21   :  { %242 = shalt.err (!%p239_p1)
}
  0x22   :  { %34 = dma.hbm_to_vmem [thread:$0]  %s351_s1, 256, %s29_s27, [#allocation7], %s272_s22, %s272_s22, %s273_s23  }
  0x23   :  { %265 = dma.done.wait [#allocation4], 128  }
  0x24   :  { %266 = vsyncadd [#allocation4], 4294967168 }
  0x25   :  { %267 = dma.done.wait [#allocation7], 256  }
  0x26   :  { %268 = vsyncadd [#allocation7], 4294967040  ;;  %vm48_vm0 = vcmask 785408   ;;  %v275_v0 = vmov 0.0   ;;  %vm276_vm1 = vmmov 0   ;;  %v196_v1 = vld [vmem:[#allocation6] sm:$0xff]  }
  0x27   :  { %49 = vst.msk [vmem:[#allocation2] sm:$0xff] %vm48_vm0, %v275_v0  ;;  %50 = vst.msk [vmem:[#allocation2 + $0x8] sm:$0xff] %vm48_vm0, %v275_v0  ;;  %181 = vmatprep.subr.bf16.mxu0 %v275_v0  ;;  %185 = vmatprep.mubr.msk.bf16.mxu0 %vm276_vm1, %v275_v0  ;;  %v197_v2 = vld [vmem:[#allocation6 + $0x8] sm:$0xff]   ;;  %v198_v3 = vld [vmem:[#allocation3] sm:$0xff]   ;;  %vm76_vm2 = vcmask 261120   ;;  %vm148_vm3 = vcmask 781312  }
  0x28   :  { %182 = vmatpush3.bf16.msra.mxu0 %v196_v1  ;;  %v173_v12 = vld [vmem:[%s352_s2] ss:$0 sm:$0xff]  ;;  %s277_s11 = smov [#allocation8]  }
  0x29   :  { %183 = vmatprep.subr.bf16.mxu0 %v275_v0  ;;  %s156_s12 = sshll.u32 %s277_s11, 4  ;;  %s157_s12 = int_to_ptr.vmem [resolvable:$true] %s156_s12 }
  0x2a   :  { %s243_s13 = scalar_lea.vmem %s157_s12, 128  ;;  %p248_p3 = scmp.lt.s32.totalorder %s157_s12, %s157_s12 }
  0x2b   :  { %p244_p2 = scmp.ne.s32.totalorder %s157_s12, %s243_s13  ;;  %p249_p4 = scmp.lt.s32.totalorder %s243_s13, %s243_s13 }
  0x2c   :  { %184 = vmatpush3.bf16.msra.mxu0 %v197_v2 }
  0x2d   :  { %p250_p5 = por %p249_p4, %p248_p3 }
  0x2e   :  { %v51_v4 = vld [vmem:[#allocation2] sm:$0xff]  ;;  %v52_v6 = vld [vmem:[#allocation2 + $0x8] sm:$0xff] }
  0x2f   :  { %186 = vmatmul.mubr.msk.bf16.vlgmr.msra.gmra.mrb[0].mxu0 %vm76_vm2, %v198_v3  ;;  %p251_p6 = pnand %p250_p5, %p244_p2 }
 0x102   :  { %v114_v5 = vpop.f32.mrb[0].mxu0 }
 0x103   :  { %v121_v7 = vadd.f32 %v114_v5, %v51_v4  ;;  %v187_v8 = vpop.f32.mrb[1].mxu0 }
 0x104   :  { %v117_v9 = vpop.f32.mrb[2].mxu0 }
 0x105   :  { %124 = vst.msk [vmem:[#allocation2] sm:$0xff] %vm48_vm0, %v121_v7  ;;  %v122_v10 = vadd.f32 %v117_v9, %v52_v6  ;;  %v188_v11 = vpop.f32.mrb[3].mxu0 }
 0x107   :  { %125 = vst.msk [vmem:[#allocation2 + $0x8] sm:$0xff] %vm48_vm0, %v122_v10 }
 0x10c   :  { %v129_v13 = vld [vmem:[#allocation2] sm:$0xff] }
 0x10d   :  { %v138_v14 = vadd.f32 %v173_v12, %v129_v13 }
 0x10e   :  { %v130_v15 = vld [vmem:[#allocation2 + $0x8] sm:$0xff] }
 0x10f   :  { %v139_v16 = vadd.f32 %v173_v12, %v130_v15  ;;  %v176_v17 = vpack.c.bf16 %v138_v14, %v138_v14 }
 0x111   :  { %v177_v18 = vpack.c.bf16 %v139_v16, %v139_v16  ;;  %149 = vst.msk [vmem:[#allocation8] sm:$0xf] %vm148_vm3, %v176_v17 }
 0x113   :  { %150 = vst.msk [vmem:[#allocation8 + $0x4] sm:$0xf] %vm148_vm3, %v177_v18 }
 0x114   :  { %254 = shalt.err (!%p251_p6)
}
 0x115   :  { %s255_s15 = scalar_lea.hbm %s353_s3, 128 }
 0x116   :  { %p256_p7 = scmp.ne.s32.totalorder %s353_s3, %s255_s15  ;;  %p259_p8 = scmp.lt.u32.totalorder %s255_s15, %s353_s3 }
 0x118   :  { %p261_p9 = pnand %p259_p8, %p256_p7 }
 0x11a   :  { %264 = shalt.err (!%p261_p9)
}
 0x11b   :  { %162 = dma.vmem_to_hbm [thread:$0]  %s157_s12, 128, %s353_s3, [#allocation5], %s272_s22, %s272_s22, %s273_s23  }
 0x11c   :  { %269 = dma.done.wait [#allocation5], 128  }
 0x11d   :  { %270 = vsyncadd [#allocation5], 4294967168 }
 0x11e   :  { %166 = vsyncpa [#allocation4], 1 }
 0x11f   :  { %167 = vsyncpa [#allocation7], 1 }
 0x120   :  { %168 = vsyncpa [#allocation5], 1 }

</bundles_post_ra>
